<compile_context>
chip_gen: v6e
topology: v6e:2x2x1
jax: 0.10.0
libtpu: 0.0.40
codegen_flags: <defaults>
</compile_context>

<pallas_src>
import functools

import jax
import jax.numpy as jnp
from jax import lax
from jax.experimental import pallas as pl
from jax.experimental.pallas import tpu as pltpu


LANES = 128
SUBLANES = 8
# 8192 rows x 128 lanes x 4 B = 4 MiB per f32 block; double-buffered input is ~8 MiB VMEM,
# comfortably inside the scoped defaults on v5e (16 MiB) and v6e/v7x (32 MiB).
MAX_TILE_ROWS = 8192
# Rows held in the register-resident accumulator of the inner reduce loop (4 vregs at 32):
# breaks the add dependency chain so the loop stays under the HBM delivery rate.
ACC_ROWS = 32


def _row_granule(dtype):
    # Native sublane tiling: 8 rows for 32-bit, 16 for 16-bit, 32 for 8-bit dtypes.
    return SUBLANES * max(1, 4 // jnp.dtype(dtype).itemsize)


def _make_one_sided_kernel(n_rows, tile_rows, acc_rows, blocks_per_split,
                           full_blocks, needs_mask, unroll):
    """Partial sums of min(x, 0) over a (n_rows, 128) slab, one (tile_rows,128) block/step."""
    chunks = tile_rows // acc_rows

    def _block_partial_sum(x_ref, base_row, masked):
        # Streaming, vreg-scale reduce: each iteration loads an (acc_rows, 128) slice,
        # does min(x, 0) and adds into a register-carried accumulator.  No full-block
        # f32 temporary ever materializes in VMEM, so the single vector-store slot
        # never becomes the binding VLIW slot.
        def body(j, acc):
            r = pl.multiple_of(j * acc_rows, acc_rows)
            v = x_ref[pl.ds(r, acc_rows), :].astype(jnp.float32)
            neg = jnp.minimum(v, 0.0)
            if masked:
                rows = (base_row + r
                        + lax.broadcasted_iota(jnp.int32, (acc_rows, LANES), 0))
                neg = jnp.where(rows < n_rows, neg, 0.0)
            return acc + neg

        return lax.fori_loop(0, chunks, body,
                             jnp.zeros((acc_rows, LANES), jnp.float32),
                             unroll=unroll)

    def kernel(x_ref, o_ref):
        s = pl.program_id(0)   # split (core) index
        k = pl.program_id(1)   # block index within the split

        # The output block doubles as the per-split accumulator (resident across k).
        @pl.when(k == 0)
        def _():
            o_ref[...] = jnp.zeros_like(o_ref)

        gb = s * blocks_per_split + k   # global row-block index

        if not needs_mask:
            # Every block is full: completely mask-free hot path.
            o_ref[...] += _block_partial_sum(x_ref, gb * tile_rows, False)[None]
        else:
            @pl.when(gb < full_blocks)
            def _():   # full blocks: mask-free hot loop
                o_ref[...] += _block_partial_sum(x_ref, gb * tile_rows, False)[None]

            @pl.when(gb >= full_blocks)
            def _():   # ragged tail block / phantom block (runs at most twice total)
                o_ref[...] += _block_partial_sum(x_ref, gb * tile_rows, True)[None]

    return kernel


def _one_sided_aligned(x2d, *, max_tile_rows):
    """sum(min(x2d, 0)) for a (n_rows, 128) slab, accumulated in f32 on-chip."""
    n_rows = x2d.shape[0]
    granule = _row_granule(x2d.dtype)
    tile_rows = max(granule, (min(max_tile_rows, n_rows) // granule) * granule)

    total_blocks = pl.cdiv(n_rows, tile_rows)
    full_blocks = n_rows // tile_rows        # blocks entirely inside the array

    # Two contiguous row-range splits, each with its own accumulator / output block,
    # so both v7x TensorCores can contribute without racing on shared state.
    num_splits = 2 if total_blocks >= 2 else 1
    blocks_per_split = pl.cdiv(total_blocks, num_splits)
    padded_blocks = num_splits * blocks_per_split
    needs_mask = padded_blocks != full_blocks   # ragged last block and/or phantom block

    acc_rows = ACC_ROWS if tile_rows % ACC_ROWS == 0 else granule
    chunks = tile_rows // acc_rows
    unroll = next(u for u in (8, 4, 2, 1) if chunks % u == 0)

    if padded_blocks > total_blocks:
        # Up to num_splits-1 trailing grid cells are "phantom": clamp their DMA to the
        # last real block (cheap re-read); the kernel masks them to zero.
        def in_map(s, k):
            return (jnp.minimum(s * blocks_per_split + k, total_blocks - 1), 0)
    else:
        def in_map(s, k):
            return (s * blocks_per_split + k, 0)

    kernel = _make_one_sided_kernel(n_rows, tile_rows, acc_rows, blocks_per_split,
                                    full_blocks, needs_mask, unroll)

    partials = pl.pallas_call(
        kernel,
        out_shape=jax.ShapeDtypeStruct((num_splits, acc_rows, LANES), jnp.float32),
        grid_spec=pltpu.PrefetchScalarGridSpec(
            num_scalar_prefetch=0,
            grid=(num_splits, blocks_per_split),
            in_specs=[pl.BlockSpec((tile_rows, LANES), in_map)],
            out_specs=pl.BlockSpec((1, acc_rows, LANES), lambda s, k: (s, 0, 0)),
        ),
        # TODO(synk): on v7x mark the split axis CORE_PARALLEL (or drive it via
        # pl.core_map + pltpu.create_tensorcore_mesh) to guarantee one split per
        # TensorCore; "parallel" is the portable choice that is safe on 1-TC chips.
        # TODO(synk): if v7x profiling shows exposed DMA between blocks, add
        # pipeline_mode=pl.Buffered(3) to the input BlockSpec (VMEM permitting).
        compiler_params=pltpu.CompilerParams(
            dimension_semantics=("parallel", "arbitrary"),
        ),
    )(x2d)
    return jnp.sum(partials)


@functools.partial(jax.jit, static_argnames=("max_tile_rows",))
def one_sided(x, *, max_tile_rows=MAX_TILE_ROWS):
    """JAX/Pallas equivalent of ONE_SIDED().forward(x): -mean(relu(-x)) as a float32 scalar."""
    n_elems = x.size
    flat = jnp.ravel(x)                       # free reshape (bitcast) under jit
    granule = _row_granule(x.dtype)

    n_rows = n_elems // LANES                 # number of full lane-dense rows
    bulk_elems = n_rows * LANES

    total = jnp.float32(0.0)
    if n_rows >= granule:
        if bulk_elems == n_elems:
            x2d = flat.reshape(n_rows, LANES)            # zero-copy: single HBM pass
        else:
            # TODO(synk): for n % 128 != 0 this prefix slice may still materialize a copy;
            # an in-kernel flat-index mask over a memory_space=pl.ANY ref would make that
            # case zero-copy as well.
            x2d = flat[:bulk_elems].reshape(n_rows, LANES)
        total = total + _one_sided_aligned(x2d, max_tile_rows=max_tile_rows)
        tail = flat[bulk_elems:]
    else:
        tail = flat                            # tiny input: plain JAX is cheaper

    if tail.size:
        total = total + jnp.sum(jnp.minimum(tail.astype(jnp.float32), 0.0))

    return total / jnp.float32(n_elems)


if __name__ == "__main__":
    key = jax.random.PRNGKey(0)

    def ref_fn(a):
        af = a.astype(jnp.float32)
        return -jnp.mean(jnp.maximum(-af, 0.0))

    # Primary: small NCHW input consistent with the module's usage.
    x = jax.random.normal(key, (2, 4, 16, 16), dtype=jnp.float32)
    result = jax.block_until_ready(one_sided(x))
    assert jnp.allclose(result, ref_fn(x), atol=1e-6, rtol=1e-5), (result, ref_fn(x))

    # Exercise the two-split / ragged-block / phantom-block / wrapper-tail / fallback
    # paths at small shapes (via a reduced tile size where needed).
    keys = jax.random.split(key, 4)
    x2 = jax.random.normal(keys[0], (2, 4, 16, 25), dtype=jnp.float32)  # 25 rows: split + ragged
    x3 = jax.random.normal(keys[1], (2, 4, 41, 16), dtype=jnp.float32)  # 41 rows: odd blocks
    x4 = jax.random.normal(keys[2], (2, 3, 15, 17), dtype=jnp.float32)  # n % 128 != 0 tail
    x5 = jax.random.normal(keys[3], (2, 4, 8, 8), dtype=jnp.float32)    # tiny: plain-JAX path
    checks = [
        (x2, {}),                          # two splits + ragged last block
        (x3, {"max_tile_rows": 16}),       # odd block count -> phantom block + clamp
        (x4, {"max_tile_rows": 8}),        # wrapper tail (<128 elems) + prefix path
        (x5, {}),                          # < 1024 elements: no kernel call
        (x.astype(jnp.bfloat16), {}),      # bf16 input, f32 accumulation
    ]
    for xi, kw in checks:
        got = jax.block_until_ready(one_sided(xi, **kw))
        want = ref_fn(xi)
        assert jnp.allclose(got, want, atol=1e-6, rtol=1e-5), (xi.shape, kw, got, want)

    print("KERNEL_OK")
</pallas_src>

<mosaic_0001>
module attributes {stable_mosaic.version = 11 : i64} {
  func.func @kernel(%arg0: i32, %arg1: i32, %arg2: memref<16x128xf32, #tpu.memory_space<vmem>>, %arg3: memref<1x8x128xf32, #tpu.memory_space<vmem>>) attributes {dimension_semantics = [#tpu.dimension_semantics<parallel>, #tpu.dimension_semantics<arbitrary>], iteration_bounds = array<i64: 1, 1>, scalar_prefetch = 0 : i64, scratch_operands = 0 : i64, tpu.core_type = #tpu.core_type<tc>, window_params = [{transform_indices = @transform_0, window_bounds = array<i64: 16, 128>}, {transform_indices = @transform_1, window_bounds = array<i64: 1, 8, 128>}]} {
    %c0_i32 = arith.constant 0 : i32
    %0 = arith.cmpi eq, %arg1, %c0_i32 : i32
    %1 = arith.extui %0 : i1 to i32
    %c0_i32_0 = arith.constant 0 : i32
    %2 = arith.cmpi ne, %1, %c0_i32_0 : i32
    scf.if %2 {
      %cst_12 = arith.constant 0.000000e+00 : f32
      %22 = vector.broadcast %cst_12 : f32 to vector<1x8x128xf32>
      %c0_13 = arith.constant 0 : index
      %c0_14 = arith.constant 0 : index
      %c0_15 = arith.constant 0 : index
      %23 = vector.load %arg3[%c0_13, %c0_14, %c0_15] : memref<1x8x128xf32, #tpu.memory_space<vmem>>, vector<1x8x128xf32>
      tpu.vector_store %arg3[%c0_13, %c0_14, %c0_15], %22 {strides = array<i32>} : memref<1x8x128xf32, #tpu.memory_space<vmem>>, vector<1x8x128xf32>,
    } else {
    }
    %c0 = arith.constant 0 : index
    %c0_1 = arith.constant 0 : index
    %c0_2 = arith.constant 0 : index
    %3 = vector.load %arg3[%c0, %c0_1, %c0_2] : memref<1x8x128xf32, #tpu.memory_space<vmem>>, vector<1x8x128xf32>
    %cst = arith.constant 0.000000e+00 : f32
    %4 = vector.broadcast %cst : f32 to vector<8x128xf32>
    %c0_i32_3 = arith.constant 0 : i32
    %c8_i32 = arith.constant 8 : i32
    %5 = arith.muli %c0_i32_3, %c8_i32 : i32
    %6 = tpu.assume_multiple %5, 8 : i32
    %7 = arith.index_cast %6 : i32 to index
    %c0_4 = arith.constant 0 : index
    %8 = vector.load %arg2[%7, %c0_4] : memref<16x128xf32, #tpu.memory_space<vmem>>, vector<8x128xf32>
    %cst_5 = arith.constant 0.000000e+00 : f32
    %9 = vector.broadcast %cst_5 : f32 to vector<8x128xf32>
    %10 = arith.minimumf %8, %9 : vector<8x128xf32>
    %11 = arith.addf %4, %10 : vector<8x128xf32>
    %c1_i32 = arith.constant 1 : i32
    %c8_i32_6 = arith.constant 8 : i32
    %12 = arith.muli %c1_i32, %c8_i32_6 : i32
    %13 = tpu.assume_multiple %12, 8 : i32
    %14 = arith.index_cast %13 : i32 to index
    %c0_7 = arith.constant 0 : index
    %15 = vector.load %arg2[%14, %c0_7] : memref<16x128xf32, #tpu.memory_space<vmem>>, vector<8x128xf32>
    %cst_8 = arith.constant 0.000000e+00 : f32
    %16 = vector.broadcast %cst_8 : f32 to vector<8x128xf32>
    %17 = arith.minimumf %15, %16 : vector<8x128xf32>
    %18 = arith.addf %11, %17 : vector<8x128xf32>
    %c2_i32 = arith.constant 2 : i32
    %19 = vector.shape_cast %18 : vector<8x128xf32> to vector<1x8x128xf32>
    %20 = arith.addf %3, %19 : vector<1x8x128xf32>
    %c0_9 = arith.constant 0 : index
    %c0_10 = arith.constant 0 : index
    %c0_11 = arith.constant 0 : index
    %21 = vector.load %arg3[%c0_9, %c0_10, %c0_11] : memref<1x8x128xf32, #tpu.memory_space<vmem>>, vector<1x8x128xf32>
    tpu.vector_store %arg3[%c0_9, %c0_10, %c0_11], %20 {strides = array<i32>} : memref<1x8x128xf32, #tpu.memory_space<vmem>>, vector<1x8x128xf32>,
    return
  }
  func.func @transform_0(%arg0: i32, %arg1: i32) -> (i32, i32) {
    %c1_i32 = arith.constant 1 : i32
    %0 = arith.muli %arg0, %c1_i32 : i32
    %1 = arith.addi %0, %arg1 : i32
    %c0_i32 = arith.constant 0 : i32
    %c0_i32_0 = arith.constant 0 : i32
    return %1, %c0_i32 : i32, i32
  }
  func.func @transform_1(%arg0: i32, %arg1: i32) -> (i32, i32, i32) {
    %c0_i32 = arith.constant 0 : i32
    %c0_i32_0 = arith.constant 0 : i32
    %c0_i32_1 = arith.constant 0 : i32
    return %arg0, %c0_i32, %c0_i32_0 : i32, i32, i32
  }
}

</mosaic_0001>

<bundles_post_ra>
// kernel: one_sided.1
= control target key start
LH: loop header
LB: loop body
LE: loop exit
PB: predicated region body
PF: predicated region fallthrough
CT: control target
= control target key end

     0   :  { %s76_s0 = inlined_call_operand.vmem [shape: f32[16,128], index: 0, kind: input, shape index: {}]   ;;  %s77_s1 = inlined_call_operand.vmem [shape: f32[1,8,128], index: 1, kind: output, shape index: {}]  }
   0x1   :  { %v36_v0 = vld [vmem:[%s76_s0] sm:$0xff]  ;;  %v55_v1 = vld [vmem:[%s76_s0 + $0x8] sm:$0xff] }
   0x2   :  { %v37_v2 = vmin.f32 %v36_v0, 0.0  ;;  %v41_v3 = vmin.f32 %v55_v1, 0.0 }
   0x4   :  { %v42_v4 = vadd.f32 %v41_v3, %v37_v2 }
   0x6   :  { %44 = vst [vmem:[%s77_s1] sm:$0xff] %v42_v4 }

</bundles_post_ra>
